<compile_context>
chip_gen: v6e
topology: v6e:2x2x1
jax: 0.10.0
libtpu: 0.0.40
codegen_flags: <defaults>
</compile_context>

<pallas_src>
import functools

import jax
import jax.numpy as jnp
from jax import lax
from jax.experimental import pallas as pl
from jax.experimental.pallas import tpu as pltpu

NUM_EMBEDDINGS = 384
BLOCK_SIZE = 256  # max sequence length for the causal mask (T <= BLOCK_SIZE)


def _head_kernel(x_ref, wqkv_ref, ot_ref, *, head_size):
    # x_ref:    (BB, T, C) activations for BB batch elements
    # wqkv_ref: (C, 3H) fused bf16 weights [Wk | Wq * H**-0.5 | Wv]
    # ot_ref:   (BB, H, T) transposed output (T on the lane axis)
    H = head_size

    x = x_ref[...].astype(jnp.bfloat16)      # no-op if activations are bf16
    wqkv = wqkv_ref[...]                     # already bf16 (cast hoisted)

    BB, T, C = x.shape

    # Single fused QKV projection for all BB batch rows, f32 accumulation.
    kqv = jnp.dot(x.reshape(BB * T, C), wqkv,
                  preferred_element_type=jnp.float32)          # (BB*T, 3H)
    kqv = kqv.reshape(BB, T, 3 * H)
    k = kqv[:, :, :H]
    q = kqv[:, :, H:2 * H]                   # H**-0.5 already folded into Wq
    v = kqv[:, :, 2 * H:]

    # q @ k^T with the transpose absorbed into the contraction (batched).
    wei = jnp.einsum('bqh,bkh->bqk',
                     q.astype(jnp.bfloat16), k.astype(jnp.bfloat16),
                     preferred_element_type=jnp.float32)       # (BB, T, T) f32

    # Causal (lower-triangular) mask from one row iota + one column iota.
    row = lax.broadcasted_iota(jnp.int32, (T, 1), 0)
    col = lax.broadcasted_iota(jnp.int32, (1, T), 1)
    causal = col <= row                                         # (T, T) bool
    wei = jnp.where(causal[None, :, :], wei, -jnp.inf)

    # Numerically stable softmax in f32; normalization deferred past PV.
    m = jnp.max(wei, axis=-1, keepdims=True)
    e = jnp.exp(wei - m)                                        # (BB, T, T)
    denom = jnp.sum(e, axis=-1, keepdims=True)                  # (BB, T, 1)

    # Dropout on the attention weights: identity (eval mode).

    out = jnp.einsum('bqk,bkh->bqh',
                     e.astype(jnp.bfloat16), v.astype(jnp.bfloat16),
                     preferred_element_type=jnp.float32)        # (BB, T, H)
    out = out * (1.0 / denom)        # exact reciprocal on the tiny (BB,T,1) tile

    # Lane-dense store: put T (multiple of 128 at production sizes) on the
    # lane axis instead of H=32, avoiding masked partial stores.
    for b in range(BB):              # static, small
        ot_ref[b] = out[b].T.astype(ot_ref.dtype)


def make_head_params(wk, wq, wv):
    """Fuse the projection weights once at parameter-prep time.

    Folds the H**-0.5 softmax scale into the query columns and stores the
    fused matrix in bf16 so no per-step cast / scale work happens in-kernel.
    """
    H = wk.shape[1]
    scale = jnp.float32(H) ** -0.5
    return jnp.concatenate([wk, wq * scale, wv], axis=1).astype(jnp.bfloat16)


def head_forward(x, wqkv, head_size):
    """x: (B, T, C) f32 or bf16; wqkv: (C, 3H) bf16 fused weights -> (B, T, H)."""
    B, T, C = x.shape
    H = head_size
    assert C == NUM_EMBEDDINGS
    assert T <= BLOCK_SIZE
    assert wqkv.shape == (C, 3 * H)

    # Block several batch elements per grid step to amortize the ~0.35us
    # per-step pipeline overhead and issue larger DMAs.
    BB = max(d for d in (8, 4, 2, 1) if B % d == 0)

    kernel = functools.partial(_head_kernel, head_size=H)

    out_t = pl.pallas_call(
        kernel,
        out_shape=jax.ShapeDtypeStruct((B, H, T), x.dtype),
        grid_spec=pltpu.PrefetchScalarGridSpec(
            num_scalar_prefetch=0,
            grid=(B // BB,),
            in_specs=[
                pl.BlockSpec((BB, T, C), lambda b: (b, 0, 0)),
                pl.BlockSpec((C, 3 * H), lambda b: (0, 0)),
            ],
            out_specs=pl.BlockSpec((BB, H, T), lambda b: (b, 0, 0)),
        ),
        compiler_params=pltpu.CompilerParams(
            dimension_semantics=("parallel",)),
    )(x, wqkv)

    # Swap the lane-dense (B, H, T) kernel layout back to the module's (B, T, H).
    return jnp.swapaxes(out_t, -2, -1)


def reference_forward(x, wk, wq, wv):
    """Plain-JAX f32 reference matching the PyTorch forward (eval mode)."""
    H = wk.shape[1]
    T = x.shape[1]
    k = x @ wk
    q = x @ wq
    v = x @ wv
    wei = (q @ jnp.swapaxes(k, -2, -1)) * (H ** -0.5)
    mask = jnp.tril(jnp.ones((T, T), dtype=bool))
    wei = jnp.where(mask, wei, -jnp.inf)
    wei = jax.nn.softmax(wei, axis=-1)
    return wei @ v


if __name__ == "__main__":
    B, T, C = 2, 8, NUM_EMBEDDINGS
    head_size = 32

    key = jax.random.PRNGKey(0)
    kx, kk, kq, kv = jax.random.split(key, 4)

    x = jax.random.normal(kx, (B, T, C), dtype=jnp.float32)
    # Deterministic "Linear(NUM_EMBEDDINGS, head_size, bias=False)" weights,
    # stored transposed as (C, H) so the kernel computes x @ W.
    scale = (1.0 / C) ** 0.5  # roughly PyTorch's default uniform bound scale
    wk = jax.random.uniform(kk, (C, head_size), jnp.float32, -scale, scale)
    wq = jax.random.uniform(kq, (C, head_size), jnp.float32, -scale, scale)
    wv = jax.random.uniform(kv, (C, head_size), jnp.float32, -scale, scale)

    # Parameter fusion happens once, outside the forward pass.
    wqkv = make_head_params(wk, wq, wv)

    out = head_forward(x, wqkv, head_size)
    out = jax.block_until_ready(out)

    ref = reference_forward(x, wk, wq, wv)
    assert out.shape == (B, T, head_size)
    # Tolerance relaxed for bf16 MXU operands (f32 accumulation / softmax).
    assert jnp.allclose(out, ref, atol=5e-2, rtol=5e-2), "mismatch vs reference"

    print("KERNEL_OK")
</pallas_src>

<mosaic_0001>
module attributes {stable_mosaic.version = 11 : i64} {
  func.func @_head_kernel(%arg0: i32, %arg1: memref<2x8x384xf32, #tpu.memory_space<vmem>>, %arg2: memref<384x96xbf16, #tpu.memory_space<vmem>>, %arg3: memref<2x32x8xf32, #tpu.memory_space<vmem>>) attributes {dimension_semantics = [#tpu.dimension_semantics<parallel>], iteration_bounds = array<i64: 1>, scalar_prefetch = 0 : i64, scratch_operands = 0 : i64, tpu.core_type = #tpu.core_type<tc>, window_params = [{transform_indices = @transform_0, window_bounds = array<i64: 2, 8, 384>}, {pipeline_mode = #tpu.pipeline_mode<synchronous>, transform_indices = @transform_1, window_bounds = array<i64: 384, 96>}, {transform_indices = @transform_2, window_bounds = array<i64: 2, 32, 8>}]} {
    %c0 = arith.constant 0 : index
    %c0_0 = arith.constant 0 : index
    %c0_1 = arith.constant 0 : index
    %0 = vector.load %arg1[%c0, %c0_0, %c0_1] : memref<2x8x384xf32, #tpu.memory_space<vmem>>, vector<2x8x384xf32>
    %1 = arith.truncf %0 : vector<2x8x384xf32> to vector<2x8x384xbf16>
    %c0_2 = arith.constant 0 : index
    %c0_3 = arith.constant 0 : index
    %2 = vector.load %arg2[%c0_2, %c0_3] : memref<384x96xbf16, #tpu.memory_space<vmem>>, vector<384x96xbf16>
    %3 = vector.shape_cast %1 : vector<2x8x384xbf16> to vector<16x384xbf16>
    %cst = arith.constant dense<0.000000e+00> : vector<16x96xf32>
    %4 = tpu.matmul %3, %2, %cst {dimension_numbers = #tpu.dot_dimension_numbers<[1], [0], [0], [1], [0, 0, 1, 1], [], []>} : vector<16x384xbf16>, vector<384x96xbf16>, vector<16x96xf32> -> vector<16x96xf32>
    %5 = vector.shape_cast %4 : vector<16x96xf32> to vector<2x8x96xf32>
    %6 = vector.extract_strided_slice %5 {offsets = [0, 0, 0], sizes = [2, 8, 32], strides = [1, 1, 1]} : vector<2x8x96xf32> to vector<2x8x32xf32>
    %7 = vector.extract_strided_slice %5 {offsets = [0, 0, 32], sizes = [2, 8, 32], strides = [1, 1, 1]} : vector<2x8x96xf32> to vector<2x8x32xf32>
    %8 = vector.extract_strided_slice %5 {offsets = [0, 0, 64], sizes = [2, 8, 32], strides = [1, 1, 1]} : vector<2x8x96xf32> to vector<2x8x32xf32>
    %9 = arith.truncf %7 : vector<2x8x32xf32> to vector<2x8x32xbf16>
    %10 = arith.truncf %6 : vector<2x8x32xf32> to vector<2x8x32xbf16>
    "tpu.trace_start"() <{level = 10 : i32, message = "bqh,bkh->bqk"}> : () -> ()
    %cst_4 = arith.constant dense<0.000000e+00> : vector<2x8x8xf32>
    %11 = tpu.matmul %9, %10, %cst_4 {dimension_numbers = #tpu.dot_dimension_numbers<[2], [2], [1], [1], [0, 0, 0, 1, 1, 1], [0], [0]>} : vector<2x8x32xbf16>, vector<2x8x32xbf16>, vector<2x8x8xf32> -> vector<2x8x8xf32>
    "tpu.trace_stop"() : () -> ()
    %12 = tpu.iota {dimensions = array<i32: 0>} : vector<8x1xi32>
    %13 = tpu.iota {dimensions = array<i32: 1>} : vector<1x8xi32>
    %14 = vector.broadcast %13 : vector<1x8xi32> to vector<8x8xi32>
    %15 = vector.broadcast %12 : vector<8x1xi32> to vector<8x8xi32>
    %16 = arith.cmpi sle, %14, %15 : vector<8x8xi32>
    %17 = vector.shape_cast %16 : vector<8x8xi1> to vector<1x8x8xi1>
    %cst_5 = arith.constant 0xFF800000 : f32
    %18 = vector.shape_cast %17 : vector<1x8x8xi1> to vector<1x8x8xi1>
    %19 = vector.broadcast %18 : vector<1x8x8xi1> to vector<2x8x8xi1>
    %20 = vector.broadcast %cst_5 : f32 to vector<2x8x8xf32>
    %21 = arith.select %19, %11, %20 : vector<2x8x8xi1>, vector<2x8x8xf32>
    %cst_6 = arith.constant dense<0xFF800000> : vector<2x8xf32>
    %22 = vector.multi_reduction <maximumf>, %21, %cst_6 [2] : vector<2x8x8xf32> to vector<2x8xf32>
    %23 = vector.shape_cast %22 : vector<2x8xf32> to vector<2x8x1xf32>
    %24 = vector.broadcast %23 : vector<2x8x1xf32> to vector<2x8x8xf32>
    %25 = arith.subf %21, %24 : vector<2x8x8xf32>
    %26 = math.exp %25 : vector<2x8x8xf32>
    %cst_7 = arith.constant dense<0.000000e+00> : vector<2x8xf32>
    %27 = vector.multi_reduction <add>, %26, %cst_7 [2] : vector<2x8x8xf32> to vector<2x8xf32>
    %28 = vector.shape_cast %27 : vector<2x8xf32> to vector<2x8x1xf32>
    %29 = arith.truncf %26 : vector<2x8x8xf32> to vector<2x8x8xbf16>
    %30 = arith.truncf %8 : vector<2x8x32xf32> to vector<2x8x32xbf16>
    "tpu.trace_start"() <{level = 10 : i32, message = "bqk,bkh->bqh"}> : () -> ()
    %cst_8 = arith.constant dense<0.000000e+00> : vector<2x8x32xf32>
    %31 = tpu.matmul %29, %30, %cst_8 {dimension_numbers = #tpu.dot_dimension_numbers<[2], [1], [1], [2], [0, 0, 0, 1, 1, 2], [0], [0]>} : vector<2x8x8xbf16>, vector<2x8x32xbf16>, vector<2x8x32xf32> -> vector<2x8x32xf32>
    "tpu.trace_stop"() : () -> ()
    %cst_9 = arith.constant 1.000000e+00 : f32
    %32 = vector.broadcast %cst_9 : f32 to vector<2x8x1xf32>
    %33 = arith.divf %32, %28 : vector<2x8x1xf32>
    %34 = vector.broadcast %33 : vector<2x8x1xf32> to vector<2x8x32xf32>
    %35 = arith.mulf %31, %34 : vector<2x8x32xf32>
    %36 = vector.extract_strided_slice %35 {offsets = [0, 0, 0], sizes = [1, 8, 32], strides = [1, 1, 1]} : vector<2x8x32xf32> to vector<1x8x32xf32>
    %37 = vector.shape_cast %36 : vector<1x8x32xf32> to vector<8x32xf32>
    %38 = tpu.transpose %37, [1, 0] : vector<8x32xf32> -> vector<32x8xf32>
    %c0_10 = arith.constant 0 : index
    %c0_11 = arith.constant 0 : index
    %c0_12 = arith.constant 0 : index
    %39 = vector.load %arg3[%c0_10, %c0_11, %c0_12] : memref<2x32x8xf32, #tpu.memory_space<vmem>>, vector<1x32x8xf32>
    %40 = vector.shape_cast %39 : vector<1x32x8xf32> to vector<32x8xf32>
    %41 = vector.shape_cast %38 : vector<32x8xf32> to vector<1x32x8xf32>
    tpu.vector_store %arg3[%c0_10, %c0_11, %c0_12], %41 {strides = array<i32>} : memref<2x32x8xf32, #tpu.memory_space<vmem>>, vector<1x32x8xf32>,
    %42 = vector.extract_strided_slice %35 {offsets = [1, 0, 0], sizes = [1, 8, 32], strides = [1, 1, 1]} : vector<2x8x32xf32> to vector<1x8x32xf32>
    %43 = vector.shape_cast %42 : vector<1x8x32xf32> to vector<8x32xf32>
    %44 = tpu.transpose %43, [1, 0] : vector<8x32xf32> -> vector<32x8xf32>
    %c1 = arith.constant 1 : index
    %c0_13 = arith.constant 0 : index
    %c0_14 = arith.constant 0 : index
    %45 = vector.load %arg3[%c1, %c0_13, %c0_14] : memref<2x32x8xf32, #tpu.memory_space<vmem>>, vector<1x32x8xf32>
    %46 = vector.shape_cast %45 : vector<1x32x8xf32> to vector<32x8xf32>
    %47 = vector.shape_cast %44 : vector<32x8xf32> to vector<1x32x8xf32>
    tpu.vector_store %arg3[%c1, %c0_13, %c0_14], %47 {strides = array<i32>} : memref<2x32x8xf32, #tpu.memory_space<vmem>>, vector<1x32x8xf32>,
    return
  }
  func.func @transform_0(%arg0: i32) -> (i32, i32, i32) {
    %c0_i32 = arith.constant 0 : i32
    %c0_i32_0 = arith.constant 0 : i32
    %c0_i32_1 = arith.constant 0 : i32
    return %arg0, %c0_i32, %c0_i32_0 : i32, i32, i32
  }
  func.func @transform_1(%arg0: i32) -> (i32, i32) {
    %c0_i32 = arith.constant 0 : i32
    %c0_i32_0 = arith.constant 0 : i32
    %c0_i32_1 = arith.constant 0 : i32
    return %c0_i32, %c0_i32_0 : i32, i32
  }
  func.func @transform_2(%arg0: i32) -> (i32, i32, i32) {
    %c0_i32 = arith.constant 0 : i32
    %c0_i32_0 = arith.constant 0 : i32
    %c0_i32_1 = arith.constant 0 : i32
    return %arg0, %c0_i32, %c0_i32_0 : i32, i32, i32
  }
}

</mosaic_0001>

<bundles_post_ra>
// kernel: tpu_custom_call.1
= control target key start
LH: loop header
LB: loop body
LE: loop exit
PB: predicated region body
PF: predicated region fallthrough
CT: control target
= control target key end

     0   :  { %v784_v0 = vmov 0.0   ;;  %vm785_vm0 = vmmov 0   ;;  %vm321_vm1 = vcmask 261120   ;;  %vm452_vm2 = vcmask 1043456   ;;  %s961_s1 = inlined_call_operand.vmem [shape: bf16[384,96], index: 1, kind: input, shape index: {}]   ;;  %s962_s0 = inlined_call_operand.vmem [shape: f32[2,8,384], index: 0, kind: input, shape index: {}]   ;;  %s963_s2 = inlined_call_operand.vmem [shape: f32[2,32,8], index: 2, kind: output, shape index: {}]  }
   0x1   :  { %704 = vmatprep.subr.bf16.mxu1 %v784_v0  ;;  %v752_v1 = vld [vmem:[%s961_s1 + $0x78] sm:$0xff]   ;;  %720 = vmatprep.mubr.msk.bf16.mxu1 %vm785_vm0, %v784_v0  ;;  %v755_v4 = vld [vmem:[%s961_s1 + $0x70] sm:$0xff]   ;;  %v758_v7 = vld [vmem:[%s961_s1 + $0x68] sm:$0xff]   ;;  %v417_v54 = vlaneseq  ;;  %vm426_vm4 = vcmask 64512  }
   0x2   :  { %v753_v2 = vld [vmem:[%s961_s1 + $0xb8] sm:$0xff]   ;;  %665 = vmatprep.subr.bf16.mxu0 %v752_v1  ;;  %v756_v5 = vld [vmem:[%s961_s1 + $0xb0] sm:$0xff]   ;;  %v759_v8 = vld [vmem:[%s961_s1 + $0xa8] sm:$0xff]  }
   0x3   :  { %v754_v3 = vld [vmem:[%s961_s1 + $0x38] sm:$0xff]   ;;  %705 = vmatpush3.bf16.msra.mxu1 %v753_v2  ;;  %v757_v6 = vld [vmem:[%s961_s1 + $0x30] sm:$0xff]   ;;  %v760_v9 = vld [vmem:[%s961_s1 + $0x28] sm:$0xff]   ;;  %v418_v55 = vshrl.u32 %v417_v54, 7  ;;  %v420_v56 = vand.u32 127, %v417_v54 }
   0x4   :  { %666 = vmatpush3.bf16.msra.mxu0 %v754_v3  ;;  %706 = vmatprep.subr.bf16.mxu1 %v784_v0  ;;  %v761_v10 = vld [vmem:[%s961_s1 + $0x60] sm:$0xff]   ;;  %v764_v13 = vld [vmem:[%s961_s1 + $0x58] sm:$0xff]   ;;  %v767_v16 = vld [vmem:[%s961_s1 + $0x50] sm:$0xff]  }
   0x5   :  { %667 = vmatprep.subr.bf16.mxu0 %v755_v4  ;;  %v762_v11 = vld [vmem:[%s961_s1 + $0xa0] sm:$0xff]   ;;  %v765_v14 = vld [vmem:[%s961_s1 + $0x98] sm:$0xff]   ;;  %v768_v17 = vld [vmem:[%s961_s1 + $0x90] sm:$0xff]   ;;  %vm421_vm3 = vcmp.le.s32.totalorder %v420_v56, %v418_v55 }
   0x6   :  { %v763_v12 = vld [vmem:[%s961_s1 + $0x20] sm:$0xff]   ;;  %v766_v15 = vld [vmem:[%s961_s1 + $0x18] sm:$0xff]   ;;  %v769_v18 = vld [vmem:[%s961_s1 + $0x10] sm:$0xff]  }
   0x7   :  { %707 = vmatpush3.bf16.msra.mxu1 %v756_v5  ;;  %v770_v19 = vld [vmem:[%s961_s1 + $0x48] sm:$0xff]   ;;  %v16_v23 = vld [vmem:[%s962_s0 + $0x20] sm:$0xff]  ;;  %v14_v27 = vld [vmem:[%s962_s0 + $0x10] sm:$0xff] }
   0x8   :  { %668 = vmatpush3.bf16.msra.mxu0 %v757_v6  ;;  %708 = vmatprep.subr.bf16.mxu1 %v784_v0  ;;  %v771_v20 = vld [vmem:[%s961_s1 + $0x88] sm:$0xff]   ;;  %v773_v24 = vld [vmem:[%s961_s1 + $0x40] sm:$0xff]   ;;  %v15_v31 = vld [vmem:[%s962_s0 + $0x18] sm:$0xff] }
   0x9   :  { %669 = vmatprep.subr.bf16.mxu0 %v758_v7  ;;  %v772_v21 = vld [vmem:[%s961_s1 + $0x8] sm:$0xff]   ;;  %v774_v26 = vld [vmem:[%s961_s1 + $0x80] sm:$0xff]  }
   0xa   :  { %v13_v22 = vld [vmem:[%s962_s0 + $0x8] sm:$0xff]  ;;  %v775_v29 = vld [vmem:[%s961_s1] sm:$0xff]   ;;  %s787_s1 = smov 64  }
   0xb   :  { %709 = vmatpush3.bf16.msra.mxu1 %v759_v8  ;;  %v663_v25 = vpack.c.bf16 %v16_v23, %v13_v22  ;;  %v17_v28 = vld [vmem:[%s962_s0 + $0x28] sm:$0xff]  ;;  %v12_v30 = vld [vmem:[%s962_s0] sm:$0xff]  ;;  %s786_s0 = smov 96  }
   0xc   :  { %670 = vmatpush3.bf16.msra.mxu0 %v760_v9  ;;  %710 = vmatprep.subr.bf16.mxu1 %v784_v0  ;;  %v664_v32 = vpack.c.bf16 %v17_v28, %v14_v27  ;;  %v662_v33 = vpack.c.bf16 %v15_v31, %v12_v30 }
   0xd   :  { %671 = vmatprep.subr.bf16.mxu0 %v761_v10  ;;  %266 = vmatprep.mubr.bf16.mxu0 %v663_v25 }
   0xf   :  { %711 = vmatpush3.bf16.msra.mxu1 %v762_v11 }
  0x10   :  { %672 = vmatpush3.bf16.msra.mxu0 %v763_v12  ;;  %712 = vmatprep.subr.bf16.mxu1 %v784_v0 }
  0x11   :  { %673 = vmatprep.subr.bf16.mxu0 %v764_v13 }
  0x13   :  { %713 = vmatpush3.bf16.msra.mxu1 %v765_v14 }
  0x14   :  { %674 = vmatpush3.bf16.msra.mxu0 %v766_v15  ;;  %714 = vmatprep.subr.bf16.mxu1 %v784_v0 }
  0x15   :  { %675 = vmatprep.subr.bf16.mxu0 %v767_v16 }
  0x17   :  { %715 = vmatpush3.bf16.msra.mxu1 %v768_v17 }
  0x18   :  { %676 = vmatpush3.bf16.msra.mxu0 %v769_v18  ;;  %716 = vmatprep.subr.bf16.mxu1 %v784_v0 }
  0x19   :  { %677 = vmatprep.subr.bf16.mxu0 %v770_v19 }
  0x1b   :  { %717 = vmatpush3.bf16.msra.mxu1 %v771_v20 }
  0x1c   :  { %678 = vmatpush3.bf16.msra.mxu0 %v772_v21  ;;  %718 = vmatprep.subr.bf16.mxu1 %v784_v0 }
  0x1d   :  { %679 = vmatprep.subr.bf16.mxu0 %v773_v24 }
  0x1f   :  { %719 = vmatpush3.bf16.msra.mxu1 %v774_v26 }
  0x20   :  { %680 = vmatpush3.bf16.msra.mxu0 %v775_v29  ;;  %730 = vmatprep.subr.bf16.mxu1 %v784_v0 }
  0x21   :  { %724 = vmatprep.subr.bf16.mxu0 %v784_v0 }
  0x22   :  { %721 = vmatmul.mubr.bf16.vlgmr.msra.gmra.mxu1 %v664_v32 }
  0x23   :  { %267 = vmatmul.mubr.bf16.vlgmr.msra.gmra.mxu0 %v662_v33  ;;  %732 = vmatprep.mubr.msk.bf16.mxu1 %vm785_vm0, %v784_v0 }
  0x24   :  { %726 = vmatprep.mubr.msk.bf16.mxu0 %vm785_vm0, %v784_v0 }
  0xe2   :  { %v309_v34 = vpop.f32.mrf.mxu1 }
  0xe3   :  { %v681_v35 = vpop.f32.mrf.mxu0 }
  0xe4   :  { %v722_v36 = vpop.f32.mrf.mxu1 }
  0xe5   :  { %v682_v37 = vpop.f32.mrf.mxu0 }
  0xe6   :  { %v683_v38 = vadd.f32 %v682_v37, %v681_v35  ;;  %v312_v39 = vpop.f32.mrf.mxu1 }
  0xe7   :  { %v684_v40 = vpop.f32.mrf.mxu0 }
  0xe8   :  { %v310_v41 = vadd.f32 %v683_v38, %v309_v34  ;;  %v723_v42 = vpop.f32.mrf.mxu1 }
  0xe9   :  { %v685_v43 = vpop.f32.mrf.mxu0 }
  0xea   :  { %v316_v44 = vpack.c.bf16 %v310_v41, %v310_v41  ;;  %v686_v45 = vadd.f32 %v685_v43, %v684_v40 }
  0xec   :  { %v313_v46 = vadd.f32 %v686_v45, %v312_v39  ;;  %319 = vrot.lane.b32.xlu0 %v316_v44, %s786_s0  ;;  %v326_v47 = vsel %vm321_vm1, %v316_v44, 0 }
  0xed   :  { %725 = vmatpush3.bf16.xpose.msra.mxu0 %v326_v47 }
  0xee   :  { %v317_v48 = vpack.c.bf16 %v313_v46, %v313_v46  ;;  %736 = vmatprep.subr.bf16.mxu0 %v784_v0 }
  0xf0   :  { %369 = vrot.lane.b32.xlu0 %v317_v48, %s786_s0  ;;  %v375_v49 = vsel %vm321_vm1, %v317_v48, 0 }
  0xf1   :  { %731 = vmatpush3.bf16.xpose.msra.mxu1 %v375_v49 }
  0xf2   :  { %742 = vmatprep.subr.bf16.mxu1 %v784_v0 }
  0xf4   :  { %447 = vrot.lane.b32.xlu0 %v316_v44, %s787_s1 }
 0x15e   :  { %v320_v50 = vpop.permute.xlu0 %319 }
 0x15f   :  { %727 = vmatmul.mubr.msk.bf16.vlgmr.msra.gmra.mxu0 %vm321_vm1, %v320_v50 }
 0x160   :  { %738 = vmatprep.mubr.msk.bf16.mxu0 %vm785_vm0, %v784_v0 }
 0x162   :  { %v370_v51 = vpop.permute.xlu0 %369 }
 0x163   :  { %733 = vmatmul.mubr.msk.bf16.vlgmr.msra.gmra.mxu1 %vm321_vm1, %v370_v51 }
 0x164   :  { %744 = vmatprep.mubr.msk.bf16.mxu1 %vm785_vm0, %v784_v0 }
 0x166   :  { %v448_v52 = vpop.permute.xlu0 %447 }
 0x167   :  { %v454_v53 = vsel %vm452_vm2, %v448_v52, 0 }
 0x168   :  { %737 = vmatpush3.bf16.msra.mxu0 %v454_v53 }
 0x21f   :  { %v362_v57 = vpop.f32.mrf.mxu0 }
 0x220   :  { %v424_v58 = vsel %vm421_vm3, %v362_v57, -inf }
 0x221   :  { %v728_v59 = vpop.f32.mrf.mxu0  ;;  %v427_v60 = vsel %vm426_vm4, %v424_v58, -inf }
 0x222   :  { %428 = vmax.xlane.f32.xlu1 %v427_v60 }
 0x223   :  { %v365_v61 = vpop.f32.mrf.mxu0  ;;  %v411_v62 = vpop.f32.mrf.mxu1 }
 0x224   :  { %v425_v63 = vsel %vm421_vm3, %v411_v62, -inf }
 0x225   :  { %v729_v1 = vpop.f32.mrf.mxu0  ;;  %v734_v0 = vpop.f32.mrf.mxu1  ;;  %v430_v2 = vsel %vm426_vm4, %v425_v63, -inf }
 0x226   :  { %431 = vmax.xlane.f32.xlu1 %v430_v2 }
 0x227   :  { %v414_v3 = vpop.f32.mrf.mxu1 }
 0x229   :  { %v735_v4 = vpop.f32.mrf.mxu1 }
 0x237   :  { %496 = vrot.lane.b32.xlu1 %v317_v48, %s787_s1 }
 0x2ab   :  { %v429_v5 = vpop.xlane.xlu1 %428 }
 0x2ac   :  { %v433_v6 = vsub.f32 %v424_v58, %v429_v5 }
 0x2ae   :  { %v435_v7 = vmul.f32 1.442695, %v433_v6 }
 0x2af   :  { %v432_v8 = vpop.xlane.xlu1 %431 }
 0x2b0   :  { %776 = vpow2.f32 %v435_v7  ;;  %v434_v9 = vsub.f32 %v425_v63, %v432_v8 }
 0x2b2   :  { %v437_v10 = vmul.f32 1.442695, %v434_v9 }
 0x2b3   :  { %v497_v11 = vpop.permute.xlu1 %496 }
 0x2b4   :  { %778 = vpow2.f32 %v437_v10  ;;  %v502_v12 = vsel %vm452_vm2, %v497_v11, 0 }
 0x2b5   :  { %743 = vmatpush3.bf16.msra.mxu1 %v502_v12 }
 0x2bd   :  { %v777_v13 = vpop.eup %776 }
 0x2be   :  { %v439_v14 = vsel %vm426_vm4, %v777_v13, 0.0  ;;  %v445_v15 = vpack.c.bf16 %v777_v13, %v777_v13 }
 0x2bf   :  { %440 = vadd.xlane.f32.xlu0 %v439_v14 }
 0x2c0   :  { %739 = vmatmul.mubr.msk.bf16.vlgmr.msra.gmra.mxu0 %vm426_vm4, %v445_v15 }
 0x2c1   :  { %v779_v16 = vpop.eup %778 }
 0x2c2   :  { %v442_v17 = vsel %vm426_vm4, %v779_v16, 0.0  ;;  %v446_v18 = vpack.c.bf16 %v779_v16, %v779_v16 }
 0x2c3   :  { %443 = vadd.xlane.f32.xlu1 %v442_v17 }
 0x2c4   :  { %745 = vmatmul.mubr.msk.bf16.vlgmr.msra.gmra.mxu1 %vm426_vm4, %v446_v18 }
 0x348   :  { %v441_v19 = vpop.xlane.xlu0 %440 }
 0x349   :  { %780 = vrcp.f32 %v441_v19 }
 0x34c   :  { %v444_v20 = vpop.xlane.xlu1 %443 }
 0x34d   :  { %782 = vrcp.f32 %v444_v20 }
 0x356   :  { %v781_v21 = vpop.eup %780 }
 0x35a   :  { %v783_v25 = vpop.eup %782 }
 0x380   :  { %v490_v22 = vpop.f32.mrf.mxu0 }
 0x381   :  { %v548_v23 = vmul.f32 %v781_v21, %v490_v22 }
 0x382   :  { %v740_v24 = vpop.f32.mrf.mxu0 }
 0x383   :  { %550 = vxpose.xlu0.b32.start.end [1/1] (short) (narrow) %v548_v23, 32 }
 0x384   :  { %v493_v26 = vpop.f32.mrf.mxu0  ;;  %v538_v27 = vpop.f32.mrf.mxu1 }
 0x385   :  { %v549_v28 = vmul.f32 %v783_v25, %v538_v27 }
 0x386   :  { %v741_v29 = vpop.f32.mrf.mxu0  ;;  %v746_v30 = vpop.f32.mrf.mxu1 }
 0x387   :  { %586 = vxpose.xlu1.b32.start.end [1/1] (short) (narrow) %v549_v28, 32 }
 0x388   :  { %v541_v31 = vpop.f32.mrf.mxu1 }
 0x38a   :  { %v747_v32 = vpop.f32.mrf.mxu1 }
 0x3ff   :  { %v566_v33 = vpop.trf.xlu0 }
 0x400   :  { %582 = vst.msk [vmem:[%s963_s2] sm:$0xff] %vm426_vm4, %v566_v33 }
 0x403   :  { %v602_v34 = vpop.trf.xlu1  ;;  %v567_v35 = vpop.trf.xlu0 }
 0x404   :  { %658 = vst.msk [vmem:[%s963_s2 + $0x20] sm:$0xff] %vm426_vm4, %v602_v34  ;;  %583 = vst.msk [vmem:[%s963_s2 + $0x8] sm:$0xff] %vm426_vm4, %v567_v35 }
 0x407   :  { %v603_v36 = vpop.trf.xlu1  ;;  %v568_v37 = vpop.trf.xlu0 }
 0x408   :  { %659 = vst.msk [vmem:[%s963_s2 + $0x28] sm:$0xff] %vm426_vm4, %v603_v36  ;;  %584 = vst.msk [vmem:[%s963_s2 + $0x10] sm:$0xff] %vm426_vm4, %v568_v37 }
 0x40b   :  { %v604_v38 = vpop.trf.xlu1  ;;  %v569_v39 = vpop.trf.xlu0 }
 0x40c   :  { %660 = vst.msk [vmem:[%s963_s2 + $0x30] sm:$0xff] %vm426_vm4, %v604_v38  ;;  %585 = vst.msk [vmem:[%s963_s2 + $0x18] sm:$0xff] %vm426_vm4, %v569_v39 }
 0x40f   :  { %v605_v40 = vpop.trf.xlu1 }
 0x410   :  { %661 = vst.msk [vmem:[%s963_s2 + $0x38] sm:$0xff] %vm426_vm4, %v605_v40 }

</bundles_post_ra>
